<compile_context>
chip_gen: v7x
topology: tpu7x:2x2x1
jax: 0.10.0
libtpu: 0.0.40
codegen_flags: <defaults>
</compile_context>

<pallas_src>
import functools

import jax
import jax.numpy as jnp
from jax import lax
from jax.experimental import pallas as pl
from jax.experimental.pallas import tpu as pltpu


_VMEM_HEADROOM = 8 * 1024 * 1024      # leave room for compiler-internal scratch


def _round_up(x, m):
    return ((x + m - 1) // m) * m


def _pick_tile(n, preferred):
    """Largest multiple of 128 that divides n and is <= preferred."""
    t = min(preferred, n)
    if n % 128 == 0:
        t = max(128, (t // 128) * 128)
        while n % t:
            t -= 128
        return t
    # TODO(synk): pad N to a 128 multiple and mask padded keys to -inf instead
    # of falling back to a single full-N tile for non-aligned spatial sizes.
    return n


def _physical_vmem_bytes():
    try:
        return int(pltpu.get_tpu_info().vmem_capacity_bytes)
    except Exception:
        return 64 * 1024 * 1024        # conservative: v7x per-TensorCore VMEM


def _vmem_limit(needed_bytes, phys_bytes):
    cap = phys_bytes - _VMEM_HEADROOM
    return int(min(cap, max(needed_bytes + (8 << 20), 32 << 20)))


def _attn_vmem_need(C, cq_pad, tq, tkv):
    bf16, f32 = 2, 4
    in_out = 2 * (cq_pad * tq * bf16                 # q   (double-buffered)
                  + (cq_pad + C) * tkv * bf16        # packed k/v
                  + C * tq * f32                     # x residual
                  + C * tq * f32)                    # output
    scratch = 2 * tq * f32 + C * tq * f32            # m, l, acc
    return in_out + scratch


# ---------------------------------------------------------------------------
# Kernel 1: fused 1x1-conv projections (q, k, v) in (C, N) layout.
#   One packed bf16 matmul  W_all @ x  (f32 accumulation) + packed f32 bias.
#   Outputs q and a packed [k; v] buffer, both bf16.
# ---------------------------------------------------------------------------
def _proj_kernel(x_ref, w_ref, b_ref, q_ref, kv_ref, *, cq_pad):
    x = x_ref[0].astype(jnp.bfloat16)                               # (C, Tn)
    w = w_ref[...]                                                  # (Cout, C) bf16
    qkv = jnp.dot(w, x, preferred_element_type=jnp.float32)         # (Cout, Tn) f32
    qkv = qkv + b_ref[...]
    q_ref[0] = qkv[:cq_pad, :].astype(q_ref.dtype)
    kv_ref[0] = qkv[cq_pad:, :].astype(kv_ref.dtype)


# ---------------------------------------------------------------------------
# Kernel 2: flash-style position attention + gamma * out + x residual.
#   energy[i, j] = <q[:, i], k[:, j]>, softmax over j, out = v @ attn^T.
#   Computed as s_t[j, i] = energy[i, j] so stats/accumulator are lane-dense.
# ---------------------------------------------------------------------------
def _attn_kernel(gamma_ref, q_ref, kv_ref, x_ref, o_ref,
                 m_sc, l_sc, acc_sc, *, cq_pad):
    j = pl.program_id(2)

    @pl.when(j == 0)
    def _():
        m_sc[...] = jnp.full_like(m_sc, -jnp.inf)
        l_sc[...] = jnp.zeros_like(l_sc)
        acc_sc[...] = jnp.zeros_like(acc_sc)

    q = q_ref[0]                                                    # (Cqp, Tq)  bf16
    kvt = kv_ref[0]                                                 # (Cqp+C, Tkv) bf16
    k = kvt[:cq_pad, :]                                             # (Cqp, Tkv)
    v = kvt[cq_pad:, :]                                             # (C,   Tkv)

    # s_t[j, i] = sum_c k[c, j] * q[c, i]  ==  energy[i, j]
    # TODO(synk): inspect MLIR for a per-step vxpose on this transposed-LHS
    # contraction; if present, emit K pre-transposed from the projection.
    s_t = lax.dot_general(k, q, (((0,), (0,)), ((), ())),
                          preferred_element_type=jnp.float32)       # (Tkv, Tq)

    m_prev = m_sc[...]                                              # (1, Tq)
    m_new = jnp.maximum(m_prev, jnp.max(s_t, axis=0, keepdims=True))
    alpha = jnp.exp(m_prev - m_new)                                 # (1, Tq)
    p_t = jnp.exp(s_t - m_new)                                      # (Tkv, Tq)

    l_sc[...] = alpha * l_sc[...] + jnp.sum(p_t, axis=0, keepdims=True)
    acc_sc[...] = alpha * acc_sc[...] + jnp.dot(
        v, p_t.astype(v.dtype), preferred_element_type=jnp.float32)  # (C, Tq)
    m_sc[...] = m_new

    @pl.when(j == pl.num_programs(2) - 1)
    def _():
        out = acc_sc[...] * pl.reciprocal(l_sc[...], approx=True)    # (C, Tq)
        o_ref[0] = gamma_ref[0] * out + x_ref[0]


def pam_forward(x_nchw, params, *, tq=1024, tkv=1024, tn=1024):
    """PAM_Module.forward.  x_nchw: (B, C, H, W) f32 -> (B, C, H, W) f32."""
    B, C, H, W = x_nchw.shape
    N = H * W
    cq = params["wq"].shape[0]
    cq_pad = _round_up(cq, 16)          # bf16 packs 16 sublanes per vreg
    cout = 2 * cq_pad + C

    tn = _pick_tile(N, tn)
    tq = _pick_tile(N, tq)
    tkv = _pick_tile(N, tkv)

    phys_vmem = _physical_vmem_bytes()
    budget = phys_vmem - _VMEM_HEADROOM

    # Shrink attention tiles until the (double-buffered) footprint fits —
    # matters on v7x's 64 MiB VMEM; v5e/v6e (128 MiB) keep the big tiles.
    while _attn_vmem_need(C, cq_pad, tq, tkv) > budget:
        if tkv > 128:
            nt = _pick_tile(N, max(128, tkv // 2))
            if nt < tkv:
                tkv = nt
                continue
        if tq > 128:
            nt = _pick_tile(N, max(128, tq // 2))
            if nt < tq:
                tq = nt
                continue
        break

    x_cn = x_nchw.reshape(B, C, N)      # NCHW is channel-major: no transpose

    # Pack the three 1x1-conv weights/biases into a single (Cout, C) matmul.
    # q/k segments padded with zero rows up to a multiple of 16 sublanes;
    # the zero channels contribute exactly 0 to attention energies.
    w_all = jnp.zeros((cout, C), jnp.float32)
    w_all = w_all.at[:cq, :].set(params["wq"])
    w_all = w_all.at[cq_pad:cq_pad + cq, :].set(params["wk"])
    w_all = w_all.at[2 * cq_pad:, :].set(params["wv"])
    w_all = w_all.astype(jnp.bfloat16)                 # bf16 MXU inputs
    b_all = jnp.zeros((cout, 1), jnp.float32)
    b_all = b_all.at[:cq, 0].set(params["bq"])
    b_all = b_all.at[cq_pad:cq_pad + cq, 0].set(params["bk"])
    b_all = b_all.at[2 * cq_pad:, 0].set(params["bv"])

    proj_need = 2 * (C * tn * 4 + cout * C * 2 + cout * 4
                     + cq_pad * tn * 2 + (cq_pad + C) * tn * 2)
    proj_cost = pl.CostEstimate(
        flops=2 * B * N * cout * C,
        transcendentals=0,
        bytes_accessed=4 * B * C * N + 2 * B * cout * N + 2 * cout * C + 4 * cout)

    q, kv = pl.pallas_call(
        functools.partial(_proj_kernel, cq_pad=cq_pad),
        out_shape=(
            jax.ShapeDtypeStruct((B, cq_pad, N), jnp.bfloat16),
            jax.ShapeDtypeStruct((B, cq_pad + C, N), jnp.bfloat16),
        ),
        grid_spec=pltpu.PrefetchScalarGridSpec(
            num_scalar_prefetch=0,
            grid=(N // tn, B),
            in_specs=[
                pl.BlockSpec((1, C, tn), lambda n, b: (b, 0, n)),    # x
                pl.BlockSpec((cout, C), lambda n, b: (0, 0)),        # packed weight
                pl.BlockSpec((cout, 1), lambda n, b: (0, 0)),        # packed bias
            ],
            out_specs=(
                pl.BlockSpec((1, cq_pad, tn), lambda n, b: (b, 0, n)),       # q
                pl.BlockSpec((1, cq_pad + C, tn), lambda n, b: (b, 0, n)),   # [k; v]
            ),
        ),
        compiler_params=pltpu.CompilerParams(
            dimension_semantics=("parallel", "parallel"),
            vmem_limit_bytes=_vmem_limit(proj_need, phys_vmem)),
        cost_estimate=proj_cost,
    )(x_cn, w_all, b_all)

    n_q_tiles = N // tq
    attn_need = _attn_vmem_need(C, cq_pad, tq, tkv)
    attn_cost = pl.CostEstimate(
        flops=2 * B * N * N * (cq_pad + C),
        transcendentals=B * N * N,
        bytes_accessed=(8 * B * C * N                         # x in + out
                        + 2 * B * cq_pad * N                  # q
                        + n_q_tiles * 2 * B * (cq_pad + C) * N))  # k/v re-reads

    out_cn = pl.pallas_call(
        functools.partial(_attn_kernel, cq_pad=cq_pad),
        out_shape=jax.ShapeDtypeStruct((B, C, N), jnp.float32),
        grid_spec=pltpu.PrefetchScalarGridSpec(
            num_scalar_prefetch=0,
            # q-tile axis leads so megacore sharding works even at B=1 (v7x);
            # kv is the innermost reduction axis.
            grid=(N // tq, B, N // tkv),
            in_specs=[
                pl.BlockSpec(memory_space=pltpu.MemorySpace.SMEM),              # gamma
                pl.BlockSpec((1, cq_pad, tq), lambda i, b, j: (b, 0, i)),       # q
                pl.BlockSpec((1, cq_pad + C, tkv), lambda i, b, j: (b, 0, j)),  # [k; v]
                pl.BlockSpec((1, C, tq), lambda i, b, j: (b, 0, i)),            # x resid
            ],
            out_specs=pl.BlockSpec((1, C, tq), lambda i, b, j: (b, 0, i)),
            scratch_shapes=[
                pltpu.VMEM((1, tq), jnp.float32),    # running max
                pltpu.VMEM((1, tq), jnp.float32),    # running sum
                pltpu.VMEM((C, tq), jnp.float32),    # output accumulator
            ],
        ),
        compiler_params=pltpu.CompilerParams(
            dimension_semantics=("parallel", "parallel", "arbitrary"),
            vmem_limit_bytes=_vmem_limit(attn_need, phys_vmem)),
        cost_estimate=attn_cost,
    )(params["gamma"], q, kv, x_cn)

    return out_cn.reshape(B, C, H, W)


def init_params(key, in_dim):
    """Deterministic parameter init matching PAM_Module.__init__ shapes.
    Conv2d(in, out, 1) weight (out, in, 1, 1) is stored as (out, in)."""
    cq = in_dim // 8
    ks = jax.random.split(key, 6)
    scale = 1.0 / jnp.sqrt(in_dim)
    return {
        "wq": jax.random.normal(ks[0], (cq, in_dim), jnp.float32) * scale,
        "bq": jax.random.normal(ks[1], (cq,), jnp.float32) * scale,
        "wk": jax.random.normal(ks[2], (cq, in_dim), jnp.float32) * scale,
        "bk": jax.random.normal(ks[3], (cq,), jnp.float32) * scale,
        "wv": jax.random.normal(ks[4], (in_dim, in_dim), jnp.float32) * scale,
        "bv": jax.random.normal(ks[5], (in_dim,), jnp.float32) * scale,
        "gamma": jnp.array([0.5], dtype=jnp.float32),   # torch.tensor([0.5])
    }


def pam_reference(x_nchw, params):
    """Plain-JAX reference mirroring the PyTorch forward exactly (f32)."""
    B, C, H, W = x_nchw.shape
    N = H * W
    xf = x_nchw.reshape(B, C, N)
    q = jnp.einsum("oc,bcn->bon", params["wq"], xf) + params["bq"][None, :, None]
    k = jnp.einsum("oc,bcn->bon", params["wk"], xf) + params["bk"][None, :, None]
    v = jnp.einsum("oc,bcn->bon", params["wv"], xf) + params["bv"][None, :, None]
    energy = jnp.einsum("bci,bcj->bij", q, k)
    attn = jax.nn.softmax(energy, axis=-1)
    out = jnp.einsum("bcj,bij->bci", v, attn)
    return (params["gamma"][0] * out + xf).reshape(B, C, H, W)


if __name__ == "__main__":
    B, C, H, W = 2, 16, 16, 16          # in_dim >= 8 so in_dim // 8 >= 1
    key = jax.random.PRNGKey(0)
    kx, kp = jax.random.split(key)
    x = jax.random.normal(kx, (B, C, H, W), jnp.float32)
    params = init_params(kp, C)

    # Small tiles so the N = 256 test exercises multi-tile online softmax.
    out = pam_forward(x, params, tq=128, tkv=128, tn=128)
    out = jax.block_until_ready(out)

    ref = pam_reference(x, params)
    assert out.shape == (B, C, H, W)
    # q/k/v, the projection matmul and attention probabilities run through
    # bf16 on the MXU (f32 accumulation), so compare with bf16 tolerance.
    max_err = jnp.max(jnp.abs(out - ref))
    assert jnp.allclose(out, ref, atol=5e-2, rtol=5e-2), (
        f"mismatch vs reference, max abs err = {max_err}")

    print("KERNEL_OK")
</pallas_src>

<mosaic_0001>
module attributes {stable_mosaic.version = 11 : i64} {
  func.func @_proj_kernel(%arg0: i32, %arg1: i32, %arg2: memref<1x16x128xf32, #tpu.memory_space<vmem>>, %arg3: memref<48x16xbf16, #tpu.memory_space<vmem>>, %arg4: memref<48x1xf32, #tpu.memory_space<vmem>>, %arg5: memref<1x16x128xbf16, #tpu.memory_space<vmem>>, %arg6: memref<1x32x128xbf16, #tpu.memory_space<vmem>>) attributes {dimension_semantics = [#tpu.dimension_semantics<parallel>, #tpu.dimension_semantics<parallel>], iteration_bounds = array<i64: 2, 2>, scalar_prefetch = 0 : i64, scratch_operands = 0 : i64, tpu.core_type = #tpu.core_type<tc>, window_params = [{transform_indices = @transform_0, window_bounds = array<i64: 1, 16, 128>}, {pipeline_mode = #tpu.pipeline_mode<synchronous>, transform_indices = @transform_1, window_bounds = array<i64: 48, 16>}, {pipeline_mode = #tpu.pipeline_mode<synchronous>, transform_indices = @transform_2, window_bounds = array<i64: 48, 1>}, {transform_indices = @transform_3, window_bounds = array<i64: 1, 16, 128>}, {transform_indices = @transform_4, window_bounds = array<i64: 1, 32, 128>}]} {
    %c0 = arith.constant 0 : index
    %c0_0 = arith.constant 0 : index
    %c0_1 = arith.constant 0 : index
    %0 = vector.load %arg2[%c0, %c0_0, %c0_1] : memref<1x16x128xf32, #tpu.memory_space<vmem>>, vector<1x16x128xf32>
    %1 = vector.shape_cast %0 : vector<1x16x128xf32> to vector<16x128xf32>
    %2 = arith.truncf %1 : vector<16x128xf32> to vector<16x128xbf16>
    %c0_2 = arith.constant 0 : index
    %c0_3 = arith.constant 0 : index
    %3 = vector.load %arg3[%c0_2, %c0_3] : memref<48x16xbf16, #tpu.memory_space<vmem>>, vector<48x16xbf16>
    %cst = arith.constant dense<0.000000e+00> : vector<48x128xf32>
    %4 = tpu.matmul %3, %2, %cst {dimension_numbers = #tpu.dot_dimension_numbers<[1], [0], [0], [1], [0, 0, 1, 1], [], []>} : vector<48x16xbf16>, vector<16x128xbf16>, vector<48x128xf32> -> vector<48x128xf32>
    %c0_4 = arith.constant 0 : index
    %c0_5 = arith.constant 0 : index
    %5 = vector.load %arg4[%c0_4, %c0_5] : memref<48x1xf32, #tpu.memory_space<vmem>>, vector<48x1xf32>
    %6 = vector.broadcast %5 : vector<48x1xf32> to vector<48x128xf32>
    %7 = arith.addf %4, %6 : vector<48x128xf32>
    %8 = vector.extract_strided_slice %7 {offsets = [0, 0], sizes = [16, 128], strides = [1, 1]} : vector<48x128xf32> to vector<16x128xf32>
    %9 = arith.truncf %8 : vector<16x128xf32> to vector<16x128xbf16>
    %c0_6 = arith.constant 0 : index
    %c0_7 = arith.constant 0 : index
    %c0_8 = arith.constant 0 : index
    %10 = vector.load %arg5[%c0_6, %c0_7, %c0_8] : memref<1x16x128xbf16, #tpu.memory_space<vmem>>, vector<1x16x128xbf16>
    %11 = vector.shape_cast %10 : vector<1x16x128xbf16> to vector<16x128xbf16>
    %12 = vector.shape_cast %9 : vector<16x128xbf16> to vector<1x16x128xbf16>
    tpu.vector_store %arg5[%c0_6, %c0_7, %c0_8], %12 {strides = array<i32>} : memref<1x16x128xbf16, #tpu.memory_space<vmem>>, vector<1x16x128xbf16>,
    %13 = vector.extract_strided_slice %7 {offsets = [16, 0], sizes = [32, 128], strides = [1, 1]} : vector<48x128xf32> to vector<32x128xf32>
    %14 = arith.truncf %13 : vector<32x128xf32> to vector<32x128xbf16>
    %c0_9 = arith.constant 0 : index
    %c0_10 = arith.constant 0 : index
    %c0_11 = arith.constant 0 : index
    %15 = vector.load %arg6[%c0_9, %c0_10, %c0_11] : memref<1x32x128xbf16, #tpu.memory_space<vmem>>, vector<1x32x128xbf16>
    %16 = vector.shape_cast %15 : vector<1x32x128xbf16> to vector<32x128xbf16>
    %17 = vector.shape_cast %14 : vector<32x128xbf16> to vector<1x32x128xbf16>
    tpu.vector_store %arg6[%c0_9, %c0_10, %c0_11], %17 {strides = array<i32>} : memref<1x32x128xbf16, #tpu.memory_space<vmem>>, vector<1x32x128xbf16>,
    return
  }
  func.func @transform_0(%arg0: i32, %arg1: i32) -> (i32, i32, i32) {
    %c0_i32 = arith.constant 0 : i32
    %c0_i32_0 = arith.constant 0 : i32
    return %arg1, %c0_i32, %arg0 : i32, i32, i32
  }
  func.func @transform_1(%arg0: i32, %arg1: i32) -> (i32, i32) {
    %c0_i32 = arith.constant 0 : i32
    %c0_i32_0 = arith.constant 0 : i32
    %c0_i32_1 = arith.constant 0 : i32
    return %c0_i32, %c0_i32_0 : i32, i32
  }
  func.func @transform_2(%arg0: i32, %arg1: i32) -> (i32, i32) {
    %c0_i32 = arith.constant 0 : i32
    %c0_i32_0 = arith.constant 0 : i32
    %c0_i32_1 = arith.constant 0 : i32
    return %c0_i32, %c0_i32_0 : i32, i32
  }
  func.func @transform_3(%arg0: i32, %arg1: i32) -> (i32, i32, i32) {
    %c0_i32 = arith.constant 0 : i32
    %c0_i32_0 = arith.constant 0 : i32
    return %arg1, %c0_i32, %arg0 : i32, i32, i32
  }
  func.func @transform_4(%arg0: i32, %arg1: i32) -> (i32, i32, i32) {
    %c0_i32 = arith.constant 0 : i32
    %c0_i32_0 = arith.constant 0 : i32
    return %arg1, %c0_i32, %arg0 : i32, i32, i32
  }
}

</mosaic_0001>

<bundles_post_ra>
// kernel: tpu_custom_call.1
= control target key start
LH: loop header
LB: loop body
LE: loop exit
PB: predicated region body
PF: predicated region fallthrough
CT: control target
= control target key end

     0   :  { %10 = vsyncpa [#allocation4], 0  ;;  %s1130_s0 = inlined_call_operand.vmem [shape: f32[2,16,256], index: 0, kind: input, shape index: {}]   ;;  %s1131_s1 = inlined_call_operand.vmem [shape: bf16[48,16], index: 1, kind: input, shape index: {}]   ;;  %s1132_s2 = inlined_call_operand.vmem [shape: f32[48,1], index: 2, kind: input, shape index: {}]   ;;  %s1133_s3 = inlined_call_operand.hbm [shape: bf16[2,16,256], index: 3, kind: output, shape index: {0}]   ;;  %s1134_s4 = inlined_call_operand.hbm [shape: bf16[2,32,256], index: 4, kind: output, shape index: {1}]  }
   0x1   :  { %12 = vsyncpa [#allocation4 + $0x1], 0 }
   0x2   :  { %13 = vsyncpa [#allocation6], 0 }
   0x3   :  { %15 = vsyncpa [#allocation6 + $0x1], 0  ;;  %s898_s15 = smov 0   ;;  %s900_s16 = smov 0  }
   0x4   :  { %s902_s17 = smov 0   ;;  %s904_s18 = smov 0  }
   0x5   :  { %s906_s19 = smov 0   ;;  %s908_s20 = smov 0  }
   0x6   :  { %s910_s21 = smov 0   ;;  %s912_s22 = smov 0  }
   0x7 LB: > { %s577_s23 = sadd.s32 4294967295, %s863_s22   ;;  %s578_s24 = sadd.s32 4294967294, %s863_s22   ;;  %s863_s22 = sphi %s912_s22, %s21_s22   ;;  %s859_s21 = sphi %s910_s21, %s1144_s21   ;;  %s855_s20 = sphi %s908_s20, %s1143_s20   ;;  %s851_s19 = sphi %s906_s19, %s1142_s19   ;;  %s847_s18 = sphi %s904_s18, %s1141_s18   ;;  %s843_s17 = sphi %s902_s17, %s1140_s17   ;;  %s839_s16 = sphi %s900_s16, %s1139_s16   ;;  %s835_s15 = sphi %s898_s15, %s1138_s15  }
   0x8   : > { %s30_s25 = sadd.s32 1, %s855_s20  ;;  %s33_s26 = sadd.s32 1, %s859_s21 }
   0x9   : > { %p31_p0 = scmp.ge.s32.totalorder %s30_s25, 2  ;;  %p49_p1 = scmp.ne.s32.totalorder %s843_s17, %s839_s16 }
   0xa   : > { %p50_p2 = scmp.eq.s32.totalorder %s863_s22, 0  ;;  %p123_p5 = scmp.eq.s32.totalorder %s577_s23, 3 }
   0xb   : > { %s1146_s25 = smov (%p31_p0, %s30_s25), 0  ;;  %s1148_s26 = smov (!%p31_p0, %s33_s26), %s859_s21 }
   0xc   : > { %s37_s27 = ssub.s32 %s855_s20, %s1146_s25  ;;  %p950_p3 = por %p50_p2, %p49_p1 }
   0xd   : > { %p35_p4 = scmp.ge.s32.totalorder %s1148_s26, 2  ;;  %p128_p6 = scmp.ne.s32.totalorder %s839_s16, %s835_s15 }
   0xe   : > { %p129_p7 = scmp.eq.s32.totalorder %s578_s24, 3  ;;  %p958_p8 = por %p123_p5, %p49_p1 }
   0xf   : > { %s1150_s26 = smov (%p35_p4, %s1148_s26), 0  ;;  %s42_s7 = sadd.s32 1, %s843_s17 }
  0x10   : > { %p962_p9 = por %p129_p7, %p128_p6  ;;  %s38_s5 = ssub.s32 %s859_s21, %s1150_s26 }
  0x11   : > { %s39_s6 = sor.u32 %s38_s5, %s37_s27  ;;  %p580_p11 = scmp.ge.s32.totalorder %s863_s22, 4 }
  0x12   : > { %p40_p10 = scmp.eq.s32.totalorder %s39_s6, 0 }
  0x13   : > { %179 = sbr.rel (%p580_p11) target bundleno = 33 (0x21), region = 24 }
  0x14   : > { %s970_s8 = scalar_select %p40_p10, %s843_s17, %s42_s7  }
  0x1a   : > { %182 = sbr.rel (!%p950_p3) target bundleno = 33 (0x21), region = 28  ;;  %s184_s9 = sand.u32 (%p950_p3), 1, %s843_s17  }
  0x1b   : > { %s582_s10 = sshll.u32 (%p950_p3), %s855_s20, 2  ;;  %s581_s11 = sshll.u32 (%p950_p3), %s184_s9, 4 }
  0x1c   : > { %s188_s12 = sadd.s32 (%p950_p3), %s859_s21, %s582_s10  ;;  %s186_s27 = scalar_lea.vmem (%p950_p3), [#allocation2], %s581_s11 }
  0x1d   : > { %s583_s13 = sshll.u32 (%p950_p3), %s188_s12, 3 }
  0x1e   : > { %s190_s24 = scalar_lea.vmem (%p950_p3), %s1130_s0, %s583_s13 }
  0x1f   : > { %v220_v0 = vld [vmem:[%s190_s24] sm:$0xff] (%p950_p3)  ;;  %v222_v1 = vld [vmem:[%s190_s24 + $0x10] sm:$0xff] (%p950_p3) }
  0x20   : > { %221 = vst [vmem:[%s186_s27] sm:$0xff] (%p950_p3), %v220_v0  ;;  %223 = vst [vmem:[%s186_s27 + $0x8] sm:$0xff] (%p950_p3), %v222_v1 }
  0x21 PF: > { %p584_p12 = scmp.ge.s32.totalorder %s863_s22, 1  ;;  %p228_p13 = scmp.lt.s32.totalorder %s863_s22, 5 }
  0x23   : > { %p229_p0 = pnand %p584_p12, %p228_p13 }
  0x24   : > { %s984_s28 = sand.u32 (!%p229_p0), 1, %s839_s16   ;;  %v865_v2 = vmov (!%p229_p0), 0.0   ;;  %vm866_vm0 = vmmov (!%p229_p0), 0   ;;  %v867_v6 = vmov (!%p229_p0), 0   ;;  %v277_v7 = vld [vmem:[%s1132_s2 + $0x10] sm:$0xff] (!%p229_p0)  ;;  %v734_v8 = vld [vmem:[%s1131_s1] sm:$0xff] (!%p229_p0)  }
  0x25   : > { %232 = sbr.rel (%p229_p0) target bundleno = 304 (0x130), region = 66  ;;  %634 = vmatprep.subr.bf16.mxu0 (!%p229_p0), %v865_v2  ;;  %648 = vmatprep.subr.bf16.mxu1 (!%p229_p0), %v865_v2  ;;  %s585_s5 = sshll.u32 (!%p229_p0), %s984_s28, 4  ;;  %v735_v9 = vld [vmem:[%s1131_s1 + $0x8] sm:$0xff] (!%p229_p0)   ;;  %v275_v10 = vld [vmem:[%s1132_s2] sm:$0xff] (!%p229_p0)  ;;  %vm326_vm1 = vcmask (!%p229_p0), 130048   ;;  %v278_v11 = vld [vmem:[%s1132_s2 + $0x18] sm:$0xff] (!%p229_p0) }
  0x26   : > { %636 = vmatprep.mubr.msk.bf16.mxu0 (!%p229_p0), %vm866_vm0, %v865_v2  ;;  %640 = vmatprep.mubr.msk.bf16.mxu1 (!%p229_p0), %vm866_vm0, %v865_v2  ;;  %s237_s6 = scalar_lea.vmem (!%p229_p0), [#allocation2], %s585_s5  ;;  %v276_v12 = vld [vmem:[%s1132_s2 + $0x8] sm:$0xff] (!%p229_p0)  ;;  %v279_v14 = vld [vmem:[%s1132_s2 + $0x20] sm:$0xff] (!%p229_p0)  ;;  %v736_v15 = vld [vmem:[%s1131_s1 + $0x10] sm:$0xff] (!%p229_p0)   ;;  %s586_s23 = sshll.u32 (!%p229_p0), %s984_s28, 3 }
  0x27   : > { %v266_v3 = vld [vmem:[%s237_s6] sm:$0xff] (!%p229_p0)  ;;  %v267_v4 = vld [vmem:[%s237_s6 + $0x8] sm:$0xff] (!%p229_p0)  ;;  %733 = vset.pattern.permute.xlu1 (!%p229_p0), %v867_v6  ;;  %732 = vset.pattern.permute.xlu0 (!%p229_p0), %v867_v6  ;;  %s602_s24 = sshll.u32 (!%p229_p0), %s847_s18, 2  ;;  %s257_s6 = scalar_lea.vmem (!%p229_p0), [#allocation3], %s586_s23 }
  0x28   : > { %v268_v5 = vpack.c.bf16 (!%p229_p0), %v267_v4, %v266_v3  ;;  %293 = vperm.xlu1 (!%p229_p0), %733, %v277_v7   ;;  %283 = vperm.xlu0 (!%p229_p0), %732, %v275_v10   ;;  %v280_v13 = vld [vmem:[%s1132_s2 + $0x28] sm:$0xff] (!%p229_p0)  ;;  %s440_s27 = sadd.s32 (!%p229_p0), %s851_s19, %s602_s24  ;;  %s443_s7 = sshll.u32 (!%p229_p0), %s257_s6, 4  ;;  %s1022_s7 = int_to_ptr.vmem [resolvable:$true] %s443_s7 }
  0x29   : > { %s603_s9 = sshll.u32 (!%p229_p0), %s440_s27, 6  ;;  %s604_s10 = sshll.u32 (!%p229_p0), %s847_s18, 3 }
  0x2a   : > { %635 = vmatpush3.bf16.msra.mxu0 (!%p229_p0), %v268_v5  ;;  %649 = vmatpush3.bf16.msra.mxu1 (!%p229_p0), %v268_v5  ;;  %s1028_s13 = scalar_lea.hbm (!%p229_p0), %s1133_s3, %s603_s9  ;;  %s1032_s14 = scalar_lea.vmem (!%p229_p0), [#allocation5], %s585_s5 }
  0x2b   : > { %s1036_s23 = sadd.s32 (!%p229_p0), %s851_s19, %s604_s10  ;;  %s424_s24 = scalar_lea.sflag (!%p229_p0), [#allocation4], %s984_s28 }
  0x2c   : > { %298 = vperm.xlu1 %733, %v278_v11   ;;  %288 = vperm.xlu0 %732, %v276_v12   ;;  %s737_s27 = scalar_lea.vmem %s1022_s7, 128  ;;  %s868_s18 = smov [#allocation3]  }
  0x2d   : > { %637 = vmatmul.mubr.msk.bf16.vlgmr.msra.gmra.mrb[0].mxu0 %vm326_vm1, %v734_v8  ;;  %641 = vmatmul.mubr.msk.bf16.vlgmr.msra.gmra.mrb[0].mxu1 %vm326_vm1, %v735_v9  ;;  %p738_p1 = scmp.ne.s32.totalorder %s1022_s7, %s737_s27  ;;  %s741_s9 = sshll.u32 %s868_s18, 4  ;;  %s742_s9 = int_to_ptr.vmem [resolvable:$false] %s741_s9 }
  0x2e   : > { %644 = vmatprep.mubr.msk.bf16.mxu1 %vm866_vm0, %v865_v2  ;;  %s743_s11 = scalar_lea.vmem %s742_s9, 256  ;;  %p744_p4 = scmp.lt.s32.totalorder %s1022_s7, %s742_s9 }
  0x2f   : > { %p739_p2 = pnand %p738_p1, %p958_p8  ;;  %p745_p5 = scmp.lt.s32.totalorder %s743_s11, %s737_s27 }
  0x30   : > { %308 = vperm.xlu1 %733, %v280_v13   ;;  %303 = vperm.xlu0 %732, %v279_v14  }
  0x31   : > { %p740_p3 = pneg %p739_p2  ;;  %p746_p6 = por %p745_p5, %p744_p4 }
  0x33   : > { %p747_p7 = pnand %p746_p6, %p740_p3 }
  0x35   : > { %645 = vmatmul.mubr.msk.bf16.gmra.mrb[4].mxu1 %vm326_vm1, %v736_v15 }
  0xa7   : > { %v294_v16 = vpop.permute.xlu1 %293  ;;  %v284_v17 = vpop.permute.xlu0 %283 }
  0xab   : > { %v299_v18 = vpop.permute.xlu1 %298  ;;  %v289_v19 = vpop.permute.xlu0 %288 }
 0x100   : > { %v370_v20 = vpop.f32.mrb[0].mxu0  ;;  %v378_v21 = vpop.f32.mrb[0].mxu1 }
 0x101   : > { %v371_v22 = vadd.f32 %v370_v20, %v284_v17  ;;  %v638_v23 = vpop.f32.mrb[1].mxu0  ;;  %v642_v24 = vpop.f32.mrb[1].mxu1  ;;  %v379_v27 = vadd.f32 %v378_v21, %v294_v16 }
 0x102   : > { %v373_v25 = vpop.f32.mrb[2].mxu0  ;;  %v381_v26 = vpop.f32.mrb[2].mxu1 }
 0x103   : > { %v374_v28 = vadd.f32 %v373_v25, %v289_v19  ;;  %v382_v29 = vadd.f32 %v381_v26, %v299_v18  ;;  %v643_v30 = vpop.f32.mrb[3].mxu1  ;;  %v639_v31 = vpop.f32.mrb[3].mxu0 }
 0x105   : > { %v617_v32 = vpack.c.bf16 %v374_v28, %v371_v22  ;;  %v622_v33 = vpack.c.bf16 %v382_v29, %v379_v27 }
 0x107   : > { %618 = vst [vmem:[%s257_s6] sm:$0xff] %v617_v32   ;;  %623 = vst [vmem:[%s1032_s14] sm:$0xff] %v622_v33  }
 0x108   : > { %v386_v34 = vpop.f32.mrb[4].mxu1 }
 0x109   : > { %750 = shalt.err (!%p747_p7)
}
 0x10a   : > { %s751_s19 = scalar_lea.hbm %s1028_s13, 128  ;;  %s755_s10 = scalar_lea.hbm %s1133_s3, 512 }
 0x10b   : > { %p752_p10 = scmp.ne.s32.totalorder %s1028_s13, %s751_s19  ;;  %p756_p13 = scmp.lt.u32.totalorder %s1028_s13, %s1133_s3 }
 0x10c   : > { %p757_p0 = scmp.lt.u32.totalorder %s755_s10, %s751_s19  ;;  %p759_p2 = scmp.lt.u32.totalorder %s751_s19, %s1028_s13 }
 0x10d   : > { %p753_p11 = pnand %p752_p10, %p958_p8 }
 0x10e   : > { %p758_p1 = por %p757_p0, %p756_p13 }
 0x10f   : > { %p754_p12 = pneg %p753_p11 }
 0x110   : > { %p760_p3 = por %p759_p2, %p758_p1 }
 0x112   : > { %p761_p4 = pnand %p760_p3, %p754_p12 }
 0x114   : > { %764 = shalt.err (!%p761_p4)
}
 0x115   : > { %s869_s27 = smov 64   ;;  %s870_s9 = smov 128   ;;  %v309_v35 = vpop.permute.xlu1 %308  ;;  %v646_v36 = vpop.f32.mrb[5].mxu1 }
 0x116   : > { %s871_s11 = smov 4   ;;  %s460_s19 = sshll.u32 %s1032_s14, 4  ;;  %v304_v37 = vpop.permute.xlu0 %303  ;;  %v389_v38 = vpop.f32.mrb[6].mxu1  ;;  %s1067_s19 = int_to_ptr.vmem [resolvable:$true] %s460_s19 }
 0x117   : > { %650 = dma.vmem_to_hbm [thread:$0]  (%p958_p8), %s1022_s7, 128, %s1028_s13, %s424_s24, %s869_s27, %s870_s9, %s871_s11   ;;  %v387_v39 = vadd.f32 %v386_v34, %v304_v37  ;;  %v390_v40 = vadd.f32 %v389_v38, %v309_v35  ;;  %v647_v41 = vpop.f32.mrb[7].mxu1 }
 0x118   : > { %s605_s5 = sshll.u32 %s1036_s23, 6  ;;  %s429_s13 = scalar_lea.sflag [#allocation6], %s984_s28 }
 0x119   : > { %v627_v42 = vpack.c.bf16 %v390_v40, %v387_v39  ;;  %s1072_s7 = scalar_lea.hbm %s1134_s4, %s605_s5  ;;  %s765_s24 = scalar_lea.vmem %s1067_s19, 256 }
 0x11a   : > { %p766_p5 = scmp.ne.s32.totalorder %s1067_s19, %s765_s24  ;;  %s872_s23 = smov [#allocation5]  }
 0x11b   : > { %629 = vst [vmem:[%s1032_s14 + $0x8] sm:$0xff] %v627_v42   ;;  %s769_s12 = sshll.u32 %s872_s23, 4  ;;  %s770_s12 = int_to_ptr.vmem [resolvable:$false] %s769_s12 }
 0x11c   : > { %p767_p6 = pnand %p766_p5, %p958_p8  ;;  %s771_s18 = scalar_lea.vmem %s770_s12, 512 }
 0x11d   : > { %p772_p10 = scmp.lt.s32.totalorder %s1067_s19, %s770_s12  ;;  %p773_p11 = scmp.lt.s32.totalorder %s771_s18, %s765_s24 }
 0x11e   : > { %p768_p7 = pneg %p767_p6 }
 0x11f   : > { %p774_p12 = por %p773_p11, %p772_p10 }
 0x121   : > { %p775_p13 = pnand %p774_p12, %p768_p7 }
 0x123   : > { %778 = shalt.err (!%p775_p13)
}
 0x124   : > { %s779_s14 = scalar_lea.hbm %s1072_s7, 256  ;;  %s783_s10 = scalar_lea.hbm %s1134_s4, 1024 }
 0x125   : > { %p780_p0 = scmp.ne.s32.totalorder %s1072_s7, %s779_s14  ;;  %p784_p3 = scmp.lt.u32.totalorder %s1072_s7, %s1134_s4 }
 0x126   : > { %p785_p4 = scmp.lt.u32.totalorder %s783_s10, %s779_s14  ;;  %p787_p6 = scmp.lt.u32.totalorder %s779_s14, %s1072_s7 }
 0x127   : > { %p781_p1 = pnand %p780_p0, %p958_p8 }
 0x128   : > { %p786_p5 = por %p785_p4, %p784_p3 }
 0x129   : > { %p782_p2 = pneg %p781_p1 }
 0x12a   : > { %p788_p7 = por %p787_p6, %p786_p5 }
 0x12c   : > { %p789_p10 = pnand %p788_p7, %p782_p2 }
 0x12e   : > { %792 = shalt.err (!%p789_p10)
}
 0x12f   : > { %651 = dma.vmem_to_hbm [thread:$0]  (%p958_p8), %s1067_s19, 256, %s1072_s7, %s429_s13, %s869_s27, %s870_s9, %s871_s11  }
 0x130 PF: > { %p661_p11 = scmp.ge.s32.totalorder %s863_s22, 2  ;;  %s475_s24 = sand.u32 1, %s835_s15  }
 0x131   : > { %s476_s18 = scalar_lea.sflag [#allocation4], %s475_s24 }
 0x132   : > { %p655_p12 = pnand %p661_p11, %p962_p9 }
 0x134   : > { %826 = dma.done.wait (!%p655_p12), %s476_s18, 128  }
 0x135   : > { %828 = vsyncadd (!%p655_p12), %s476_s18, 4294967168  ;;  %s485_s29 = scalar_lea.sflag [#allocation6], %s475_s24 }
 0x136   : > { %830 = dma.done.wait (!%p655_p12), %s485_s29, 256  }
 0x137   : > { %832 = vsyncadd (!%p655_p12), %s485_s29, 4294967040  ;;  %s21_s22 = sadd.s32 1, %s863_s22   ;;  %s1138_s15 = smov %s839_s16 }
 0x138   : > { %p18_p13 = scmp.ge.s32.totalorder %s21_s22, 6   ;;  %s1139_s16 = smov %s843_s17 }
 0x139   : > { %s1140_s17 = smov %s970_s8  ;;  %s1141_s18 = smov %s855_s20 }
 0x13a   : > { %s1142_s19 = smov %s859_s21  ;;  %s1143_s20 = smov %s1146_s25 }
 0x13b   : > { %s1144_s21 = smov %s1150_s26  ;;  %20 = sbr.rel (!%p18_p13) target bundleno = 7 (0x7), region = 127 }
 0x142   :  { %490 = vsyncpa [#allocation4], 1 }
 0x143   :  { %492 = vsyncpa [#allocation4 + $0x1], 1 }
 0x144   :  { %493 = vsyncpa [#allocation6], 1 }
 0x145   :  { %495 = vsyncpa [#allocation6 + $0x1], 1 }

</bundles_post_ra>
